<compile_context>
chip_gen: v6e
topology: v6e:2x2x1
jax: 0.10.0
libtpu: 0.0.40
codegen_flags: <defaults>
</compile_context>

<pallas_src>
import numpy as np

import jax
import jax.numpy as jnp
from jax.experimental import pallas as pl
from jax.experimental.pallas import tpu as pltpu

_LANE = 128

# ---- Cody-Waite split of pi/2 (built exactly with numpy at import time) ----
_pio2_f32 = np.array([np.pi / 2.0], dtype=np.float32)
# hi keeps only the top mantissa bits -> q * _PIO2_HI is exact for q < 2**16
_PIO2_HI = float((_pio2_f32.view(np.uint32) & np.uint32(0xFFFFF000)).view(np.float32)[0])
_PIO2_LO = float(np.float32(np.pi / 2.0 - _PIO2_HI))
_TWO_OVER_PI = float(np.float32(2.0 / np.pi))

# Taylor coefficients on |r| <= pi/4 (max abs error ~3e-7 — far below the 1e-3 use case).
_S1, _S2, _S3 = -1.0 / 6.0, 1.0 / 120.0, -1.0 / 5040.0
_C1, _C2, _C3, _C4 = -0.5, 1.0 / 24.0, -1.0 / 720.0, 1.0 / 40320.0


def _sincos_time_emb_kernel(time_ref, inv_ref, out_ref):
    # time_ref : (TILE_B, 1)        f32
    # inv_ref  : (1, HALF)          f32  = 1/f (zero-padded past dim//2)
    # out_ref  : (TILE_B, 2*HALF)   out_dtype
    x = time_ref[...] * inv_ref[...]                       # t / f as a reciprocal multiply

    # One shared range reduction for BOTH sin and cos:  x = q*(pi/2) + r, |r| <= pi/4.
    q = jnp.floor(x * _TWO_OVER_PI + 0.5)
    r = (x - q * _PIO2_HI) - q * _PIO2_LO                  # Cody-Waite two-term reduction
    qi = q.astype(jnp.int32) & 3                           # quadrant (handles negatives)

    r2 = r * r
    sin_r = r * (1.0 + r2 * (_S1 + r2 * (_S2 + r2 * _S3)))
    cos_r = 1.0 + r2 * (_C1 + r2 * (_C2 + r2 * (_C3 + r2 * _C4)))

    # sin(x): [sin_r, cos_r, -sin_r, -cos_r][qi] ; cos(x): [cos_r, -sin_r, -cos_r, sin_r][qi]
    swap = (qi & 1) == 1
    sin_q = jnp.where(swap, cos_r, sin_r)
    cos_q = jnp.where(swap, sin_r, cos_r)
    sin_x = jnp.where(qi >= 2, -sin_q, sin_q)
    cos_x = jnp.where((qi == 1) | (qi == 2), -cos_q, cos_q)

    # Single lane-dense full-block store of [sin | cos].
    out_ref[...] = jnp.concatenate([sin_x, cos_x], axis=-1).astype(out_ref.dtype)


def sinusoidal_time_embedding(time: jax.Array, dim: int, *,
                              out_dtype=jnp.float32,
                              use_pallas=None) -> jax.Array:
    """Pallas equivalent of SinusoidalTimeEmbedding(dim).forward(time)."""
    assert dim % 2 == 0, "dim must be even"
    b = time.shape[0]
    half = dim // 2
    out_dtype = jnp.dtype(out_dtype)
    itemsize = out_dtype.itemsize

    inv64 = 1.0 / (10000.0 ** (np.arange(half, dtype=np.float64) / half))

    # Standalone kernel forces an HBM round trip + dispatch; below a few MiB of output,
    # let XLA fuse the op into its consumer instead.
    if use_pallas is None:
        use_pallas = b * dim * itemsize >= (4 << 20)
    if not use_pallas:
        t = time.astype(jnp.float32)[:, None]
        emb = t * jnp.asarray(inv64, dtype=jnp.float32)[None, :]
        return jnp.concatenate([jnp.sin(emb), jnp.cos(emb)], axis=-1).astype(out_dtype)

    # Lane-dense out_spec: pad the half-width to a multiple of 128 only when dim itself is
    # not already lane aligned; wrapper slices the padding away afterwards.
    if dim % _LANE == 0:
        half_arg = half
    else:
        half_arg = ((half + _LANE - 1) // _LANE) * _LANE
    dim_p = 2 * half_arg

    inv_p = np.zeros((1, half_arg), dtype=np.float32)
    inv_p[0, :half] = inv64.astype(np.float32)

    # Sublane multiple: 8 (f32) / 16 (bf16) / 32 (8-bit) so stores stay unmasked when packed.
    sub = max(8, 32 // itemsize)
    # Batch tile from a byte budget (~4 MiB of f32-equivalent output per block): big enough
    # to amortize the ~0.35 us per-grid-step overhead and hit ~85%+ of HBM roofline, small
    # enough that double-buffered output + the ~5 half-width f32 temporaries fit well inside
    # the 32 MiB scoped-VMEM budget (safe on v5e/v6e/v7x).
    block_budget = 4 << 20
    rows_budget = max(sub, (block_budget // (dim_p * 4)) // sub * sub)
    tile_b = min(rows_budget, ((b + sub - 1) // sub) * sub)
    grid = (pl.cdiv(b, tile_b),)

    time2d = time.astype(jnp.float32).reshape(b, 1)

    out_p = pl.pallas_call(
        _sincos_time_emb_kernel,
        out_shape=jax.ShapeDtypeStruct((b, dim_p), out_dtype),
        grid=grid,
        in_specs=[
            pl.BlockSpec((tile_b, 1), lambda i: (i, 0)),     # time tile (pipelined)
            pl.BlockSpec((1, half_arg), lambda i: (0, 0)),   # 1/f table (constant block)
        ],
        out_specs=pl.BlockSpec((tile_b, dim_p), lambda i: (i, 0)),
        compiler_params=pltpu.CompilerParams(
            dimension_semantics=("parallel",),
            vmem_limit_bytes=32 << 20,
        ),
    )(time2d, jnp.asarray(inv_p))

    if half_arg == half:
        return out_p
    return jnp.concatenate(
        [out_p[:, :half], out_p[:, half_arg:half_arg + half]], axis=-1)


def _reference(time: jax.Array, dim: int) -> jax.Array:
    """Direct transliteration of the PyTorch module (concat [sin | cos], denominator = dim//2)."""
    half = dim // 2
    factor = 10000.0 ** (jnp.arange(half, dtype=jnp.float32) / half)
    t_emb = time.astype(jnp.float32)[:, None] / factor[None, :]
    return jnp.concatenate([jnp.sin(t_emb), jnp.cos(t_emb)], axis=-1)


if __name__ == "__main__":
    key = jax.random.PRNGKey(0)
    batch = 8
    dim = 32
    # Deterministic "timesteps" in a diffusion-like range.
    t_in = jax.random.uniform(key, (batch,), dtype=jnp.float32, minval=0.0, maxval=1000.0)

    # Force the Pallas path so the kernel actually runs at this small test size.
    out = sinusoidal_time_embedding(t_in, dim, use_pallas=True)
    out = jax.block_until_ready(out)

    ref = _reference(t_in, dim)
    assert out.shape == (batch, dim), out.shape
    # Reciprocal-multiply (vs divide) and the Cody-Waite + Taylor sin/cos keep the error
    # <= ~5e-5 for arguments up to ~1e3 — well within tolerance.
    assert jnp.allclose(out, ref, atol=1e-3, rtol=1e-5), "mismatch vs reference"

    print("KERNEL_OK")
</pallas_src>

<mosaic_0001>
module attributes {stable_mosaic.version = 11 : i64} {
  func.func @_sincos_time_emb_kernel(%arg0: i32, %arg1: memref<8x1xf32, #tpu.memory_space<vmem>>, %arg2: memref<1x128xf32, #tpu.memory_space<vmem>>, %arg3: memref<8x256xf32, #tpu.memory_space<vmem>>) attributes {dimension_semantics = [#tpu.dimension_semantics<parallel>], iteration_bounds = array<i64: 1>, scalar_prefetch = 0 : i64, scratch_operands = 0 : i64, tpu.core_type = #tpu.core_type<tc>, window_params = [{transform_indices = @transform_0, window_bounds = array<i64: 8, 1>}, {pipeline_mode = #tpu.pipeline_mode<synchronous>, transform_indices = @transform_1, window_bounds = array<i64: 1, 128>}, {transform_indices = @transform_2, window_bounds = array<i64: 8, 256>}]} {
    %c0 = arith.constant 0 : index
    %c0_0 = arith.constant 0 : index
    %0 = vector.load %arg1[%c0, %c0_0] : memref<8x1xf32, #tpu.memory_space<vmem>>, vector<8x1xf32>
    %c0_1 = arith.constant 0 : index
    %c0_2 = arith.constant 0 : index
    %1 = vector.load %arg2[%c0_1, %c0_2] : memref<1x128xf32, #tpu.memory_space<vmem>>, vector<1x128xf32>
    %2 = vector.broadcast %0 : vector<8x1xf32> to vector<8x128xf32>
    %3 = vector.broadcast %1 : vector<1x128xf32> to vector<8x128xf32>
    %4 = arith.mulf %2, %3 : vector<8x128xf32>
    %cst = arith.constant 0.636619746 : f32
    %5 = vector.broadcast %cst : f32 to vector<8x128xf32>
    %6 = arith.mulf %4, %5 : vector<8x128xf32>
    %cst_3 = arith.constant 5.000000e-01 : f32
    %7 = vector.broadcast %cst_3 : f32 to vector<8x128xf32>
    %8 = arith.addf %6, %7 : vector<8x128xf32>
    %9 = math.floor %8 : vector<8x128xf32>
    %cst_4 = arith.constant 1.5703125 : f32
    %10 = vector.broadcast %cst_4 : f32 to vector<8x128xf32>
    %11 = arith.mulf %9, %10 : vector<8x128xf32>
    %12 = arith.subf %4, %11 : vector<8x128xf32>
    %cst_5 = arith.constant 4.83826792E-4 : f32
    %13 = vector.broadcast %cst_5 : f32 to vector<8x128xf32>
    %14 = arith.mulf %9, %13 : vector<8x128xf32>
    %15 = arith.subf %12, %14 : vector<8x128xf32>
    %16 = arith.fptosi %9 : vector<8x128xf32> to vector<8x128xi32>
    %c3_i32 = arith.constant 3 : i32
    %17 = vector.broadcast %c3_i32 : i32 to vector<8x128xi32>
    %18 = arith.andi %16, %17 : vector<8x128xi32>
    %19 = arith.mulf %15, %15 : vector<8x128xf32>
    %cst_6 = arith.constant -1.98412701E-4 : f32
    %20 = vector.broadcast %cst_6 : f32 to vector<8x128xf32>
    %21 = arith.mulf %19, %20 : vector<8x128xf32>
    %cst_7 = arith.constant 0.00833333377 : f32
    %22 = vector.broadcast %cst_7 : f32 to vector<8x128xf32>
    %23 = arith.addf %22, %21 : vector<8x128xf32>
    %24 = arith.mulf %19, %23 : vector<8x128xf32>
    %cst_8 = arith.constant -0.166666672 : f32
    %25 = vector.broadcast %cst_8 : f32 to vector<8x128xf32>
    %26 = arith.addf %25, %24 : vector<8x128xf32>
    %27 = arith.mulf %19, %26 : vector<8x128xf32>
    %cst_9 = arith.constant 1.000000e+00 : f32
    %28 = vector.broadcast %cst_9 : f32 to vector<8x128xf32>
    %29 = arith.addf %28, %27 : vector<8x128xf32>
    %30 = arith.mulf %15, %29 : vector<8x128xf32>
    %cst_10 = arith.constant 2.48015876E-5 : f32
    %31 = vector.broadcast %cst_10 : f32 to vector<8x128xf32>
    %32 = arith.mulf %19, %31 : vector<8x128xf32>
    %cst_11 = arith.constant -0.00138888892 : f32
    %33 = vector.broadcast %cst_11 : f32 to vector<8x128xf32>
    %34 = arith.addf %33, %32 : vector<8x128xf32>
    %35 = arith.mulf %19, %34 : vector<8x128xf32>
    %cst_12 = arith.constant 0.0416666679 : f32
    %36 = vector.broadcast %cst_12 : f32 to vector<8x128xf32>
    %37 = arith.addf %36, %35 : vector<8x128xf32>
    %38 = arith.mulf %19, %37 : vector<8x128xf32>
    %cst_13 = arith.constant -5.000000e-01 : f32
    %39 = vector.broadcast %cst_13 : f32 to vector<8x128xf32>
    %40 = arith.addf %39, %38 : vector<8x128xf32>
    %41 = arith.mulf %19, %40 : vector<8x128xf32>
    %cst_14 = arith.constant 1.000000e+00 : f32
    %42 = vector.broadcast %cst_14 : f32 to vector<8x128xf32>
    %43 = arith.addf %42, %41 : vector<8x128xf32>
    %c1_i32 = arith.constant 1 : i32
    %44 = vector.broadcast %c1_i32 : i32 to vector<8x128xi32>
    %45 = arith.andi %18, %44 : vector<8x128xi32>
    %c1_i32_15 = arith.constant 1 : i32
    %46 = vector.broadcast %c1_i32_15 : i32 to vector<8x128xi32>
    %47 = arith.cmpi eq, %45, %46 : vector<8x128xi32>
    %48 = arith.select %47, %43, %30 : vector<8x128xi1>, vector<8x128xf32>
    %49 = arith.select %47, %30, %43 : vector<8x128xi1>, vector<8x128xf32>
    %c2_i32 = arith.constant 2 : i32
    %50 = vector.broadcast %c2_i32 : i32 to vector<8x128xi32>
    %51 = arith.cmpi sge, %18, %50 : vector<8x128xi32>
    %cst_16 = arith.constant 0.000000e+00 : f32
    %52 = vector.broadcast %cst_16 : f32 to vector<8x128xf32>
    %53 = arith.subf %52, %48 : vector<8x128xf32>
    %54 = arith.select %51, %53, %48 : vector<8x128xi1>, vector<8x128xf32>
    %c1_i32_17 = arith.constant 1 : i32
    %55 = vector.broadcast %c1_i32_17 : i32 to vector<8x128xi32>
    %56 = arith.cmpi eq, %18, %55 : vector<8x128xi32>
    %c2_i32_18 = arith.constant 2 : i32
    %57 = vector.broadcast %c2_i32_18 : i32 to vector<8x128xi32>
    %58 = arith.cmpi eq, %18, %57 : vector<8x128xi32>
    %59 = arith.ori %56, %58 : vector<8x128xi1>
    %cst_19 = arith.constant 0.000000e+00 : f32
    %60 = vector.broadcast %cst_19 : f32 to vector<8x128xf32>
    %61 = arith.subf %60, %49 : vector<8x128xf32>
    %62 = arith.select %59, %61, %49 : vector<8x128xi1>, vector<8x128xf32>
    %63 = tpu.concatenate %54, %62 in 1 : vector<8x128xf32>, vector<8x128xf32> -> vector<8x256xf32>
    %c0_20 = arith.constant 0 : index
    %c0_21 = arith.constant 0 : index
    %64 = vector.load %arg3[%c0_20, %c0_21] : memref<8x256xf32, #tpu.memory_space<vmem>>, vector<8x256xf32>
    tpu.vector_store %arg3[%c0_20, %c0_21], %63 {strides = array<i32>} : memref<8x256xf32, #tpu.memory_space<vmem>>, vector<8x256xf32>,
    return
  }
  func.func @transform_0(%arg0: i32) -> (i32, i32) {
    %c0_i32 = arith.constant 0 : i32
    %c0_i32_0 = arith.constant 0 : i32
    return %arg0, %c0_i32 : i32, i32
  }
  func.func @transform_1(%arg0: i32) -> (i32, i32) {
    %c0_i32 = arith.constant 0 : i32
    %c0_i32_0 = arith.constant 0 : i32
    %c0_i32_1 = arith.constant 0 : i32
    return %c0_i32, %c0_i32_0 : i32, i32
  }
  func.func @transform_2(%arg0: i32) -> (i32, i32) {
    %c0_i32 = arith.constant 0 : i32
    %c0_i32_0 = arith.constant 0 : i32
    return %arg0, %c0_i32 : i32, i32
  }
}

</mosaic_0001>

<bundles_post_ra>
// kernel: tpu_custom_call.1
= control target key start
LH: loop header
LB: loop body
LE: loop exit
PB: predicated region body
PF: predicated region fallthrough
CT: control target
= control target key end

     0   :  { %s133_s0 = inlined_call_operand.vmem [shape: f32[8,1], index: 0, kind: input, shape index: {}]   ;;  %s134_s1 = inlined_call_operand.vmem [shape: f32[1,128], index: 1, kind: input, shape index: {}]   ;;  %s135_s2 = inlined_call_operand.hbm [shape: f32[8,256], index: 2, kind: output, shape index: {}]  }
   0x1   :  { %v12_v0 = vld [vmem:[%s133_s0] sm:$0xff] }
   0x2   :  { %7 = vsyncpa [#allocation3], 0  ;;  %v107_v1 = vmov 0   ;;  %v79_v2 = vld [vmem:[%s134_s1] ss:$0 sm:$0xff]  ;;  %s108_s0 = smov [#allocation2]  }
   0x3   :  { %84 = vset.pattern.permute.xlu0 %v107_v1  ;;  %s71_s1 = sshll.u32 %s108_s0, 4  ;;  %s72_s1 = int_to_ptr.vmem [resolvable:$true] %s71_s1 }
   0x4   :  { %16 = vperm.xlu0 %84, %v12_v0   ;;  %s85_s13 = scalar_lea.vmem %s72_s1, 256  ;;  %p90_p1 = scmp.lt.s32.totalorder %s72_s1, %s72_s1 }
   0x5   :  { %p86_p0 = scmp.ne.s32.totalorder %s72_s1, %s85_s13  ;;  %p91_p2 = scmp.lt.s32.totalorder %s85_s13, %s85_s13 }
   0x7   :  { %p92_p3 = por %p91_p2, %p90_p1 }
   0x9   :  { %p93_p4 = pnand %p92_p3, %p86_p0 }
  0x7f   :  { %v17_v3 = vpop.permute.xlu0 %16 }
  0x80   :  { %v25_v4 = vmul.f32 %v79_v2, %v17_v3 }
  0x82   :  { %v26_v5 = vmul.f32 0.63661975, %v25_v4 }
  0x84   :  { %v27_v6 = vadd.f32 0.5, %v26_v5 }
  0x86   :  { %v28_v7 = vfloor.f32 %v27_v6 }
  0x88   :  { %v29_v8 = vmul.f32 1.5703125, %v28_v7  ;;  %v31_v10 = vmul.f32 0.0004838268, %v28_v7  ;;  %v80_v13 = vtrunc.f32 %v28_v7 }
  0x8a   :  { %v30_v9 = vsub.f32 %v25_v4, %v29_v8  ;;  %v81_v18 = vcvt.f32.s32 %v80_v13 }
  0x8c   :  { %v32_v11 = vsub.f32 %v30_v9, %v31_v10  ;;  %v34_v23 = vand.u32 3, %v81_v18 }
  0x8e   :  { %v35_v12 = vmul.f32 %v32_v11, %v32_v11  ;;  %v51_v28 = vand.u32 1, %v34_v23  ;;  %vm58_vm1 = vcmp.eq.s32.totalorder %v34_v23, 1  ;;  %vm59_vm2 = vcmp.eq.s32.totalorder %v34_v23, 2 }
  0x8f   :  { %vm55_vm3 = vcmp.ge.s32.totalorder %v34_v23, 2  ;;  %vm60_vm4 = vmor %vm58_vm1, %vm59_vm2 }
  0x90   :  { %v36_v14 = vmul.f32 -0.0001984127, %v35_v12  ;;  %v43_v15 = vmul.f32 2.4801588e-05, %v35_v12  ;;  %vm52_vm0 = vcmp.eq.s32.totalorder %v51_v28, 1 }
  0x92   :  { %v37_v16 = vadd.f32 0.008333334, %v36_v14  ;;  %v44_v17 = vadd.f32 -0.0013888889, %v43_v15 }
  0x94   :  { %v38_v19 = vmul.f32 %v37_v16, %v35_v12  ;;  %v45_v20 = vmul.f32 %v44_v17, %v35_v12 }
  0x96   :  { %v39_v21 = vadd.f32 -0.16666667, %v38_v19  ;;  %v46_v22 = vadd.f32 0.041666668, %v45_v20 }
  0x98   :  { %v40_v24 = vmul.f32 %v39_v21, %v35_v12  ;;  %v47_v25 = vmul.f32 %v46_v22, %v35_v12 }
  0x9a   :  { %v41_v26 = vadd.f32 1.0, %v40_v24  ;;  %v48_v27 = vadd.f32 -0.5, %v47_v25 }
  0x9c   :  { %v49_v29 = vmul.f32 %v48_v27, %v35_v12  ;;  %v42_v30 = vmul.f32 %v41_v26, %v32_v11 }
  0x9e   :  { %v50_v31 = vadd.f32 1.0, %v49_v29 }
  0xa0   :  { %v53_v32 = vsel %vm52_vm0, %v50_v31, %v42_v30  ;;  %v54_v33 = vsel %vm52_vm0, %v42_v30, %v50_v31 }
  0xa1   :  { %v56_v34 = vsub.f32 0.0, %v53_v32  ;;  %v61_v35 = vsub.f32 0.0, %v54_v33 }
  0xa3   :  { %v57_v36 = vsel %vm55_vm3, %v56_v34, %v53_v32  ;;  %v62_v37 = vsel %vm60_vm4, %v61_v35, %v54_v33 }
  0xa4   :  { %63 = vst [vmem:[#allocation2] sm:$0xff] %v57_v36  ;;  %64 = vst [vmem:[#allocation2 + $0x8] sm:$0xff] %v62_v37 }
  0xa5   :  { %96 = shalt.err (!%p93_p4)
}
  0xa6   :  { %74 = dma.vmem_to_hbm [thread:$0]  %s72_s1, 256, %s135_s2, [#allocation3]  }
  0xa7   :  { %105 = dma.done.wait [#allocation3], 256  }
  0xa8   :  { %106 = vsyncadd [#allocation3], 4294967040 }
  0xa9   :  { %78 = vsyncpa [#allocation3], 1 }

</bundles_post_ra>
